<compile_context>
chip_gen: v6e
topology: v6e:2x2x1
jax: 0.10.0
libtpu: 0.0.40
codegen_flags: <defaults>
</compile_context>

<pallas_src>
import functools

import jax
import jax.numpy as jnp
from jax.experimental import pallas as pl
from jax.experimental.pallas import tpu as pltpu


# ----------------------------------------------------------------------------
# Fused Pallas kernel: in-kernel embedding/projection gather + LSTM recurrence
# + MLP classifier head.  Grid-less: one launch, everything in VMEM / vregs.
# ----------------------------------------------------------------------------
def _unilstm_kernel(S, Bp, H, Vp, tok_ref, par_ref, out_ref):
    """
    tok_ref : (S*Bp, 1) int32   time-major token ids (padding id 0)
    par_ref : (Vp + 2H + 8 + 4H + 8, 4H) f32 packed parameter slab:
        [0        : Vp      ]  gx_table = word_emb @ W_ih + (b_ih+b_hh)   (Vp, 4H)
        [Vp       : Vp+H    ]  W_hh  (fused gate order i|f|g|o)           (H, 4H)
        [Vp+H     : Vp+2H   ]  W1    (lane-padded to 4H cols)             (H, 4H)
        [Vp+2H    : +8      ]  b1 in row 0 (lane-padded)                  (8, 4H)
        [..       : +4H     ]  W2    (row/lane padded to 4H x 4H)         (4H,4H)
        [..       : +8      ]  b2 in row 0 (lane-padded)                  (8, 4H)
    out_ref : (S*Bp, 4H) f32   lane-dense logits (real classes in [:, :C])
    """
    G = 4 * H
    SB = S * Bp
    TAB0 = 0
    WHH0 = Vp
    W10 = Vp + H
    B10 = Vp + 2 * H
    W20 = B10 + 8
    B20 = W20 + G

    # ---- fused embedding lookup + input projection (one-hot MXU gather) -----
    ids = tok_ref[...]                                           # (SB, 1) int32
    vlane = jax.lax.broadcasted_iota(jnp.int32, (SB, Vp), 1)
    onehot = (vlane == ids).astype(jnp.float32)                  # (SB, Vp)
    gx_all = jnp.dot(onehot, par_ref[TAB0:TAB0 + Vp, :],
                     preferred_element_type=jnp.float32)         # (SB, 4H), bias folded in

    w_hh = par_ref[WHH0:WHH0 + H, :]                             # (H, 4H) fused gates

    # lane mask selecting the 'g' gate block (tanh); hoisted out of the loop.
    glane = jax.lax.broadcasted_iota(jnp.int32, (Bp, G), 1)
    is_g = (glane >= 2 * H) & (glane < 3 * H)

    h = jnp.zeros((Bp, H), jnp.float32)
    c = jnp.zeros((Bp, H), jnp.float32)
    h_steps = []

    # ---- serial recurrence: ONE (Bp,H)x(H,4H) MXU matmul per time step ------
    for t in range(S):                     # S static & small -> fully unrolled
        gates = gx_all[t * Bp:(t + 1) * Bp, :] + jnp.dot(
            h, w_hh, preferred_element_type=jnp.float32)         # (Bp, 4H)
        act = jnp.where(is_g, jnp.tanh(gates), jax.nn.sigmoid(gates))
        i_g = act[:, 0 * H:1 * H]
        f_g = act[:, 1 * H:2 * H]
        g_g = act[:, 2 * H:3 * H]
        o_g = act[:, 3 * H:4 * H]
        c = f_g * c + i_g * g_g
        h = o_g * jnp.tanh(c)
        h_steps.append(h)                  # stays in vregs; no per-step store

    h_all = jnp.concatenate(h_steps, axis=0)                     # (SB, H)

    # ---- fused MLP classifier head (lane-dense, unmasked output store) ------
    z = jnp.tanh(
        jnp.dot(h_all, par_ref[W10:W10 + H, :],
                preferred_element_type=jnp.float32)
        + par_ref[B10:B10 + 1, :])
    out_ref[...] = (
        jnp.dot(z, par_ref[W20:W20 + G, :],
                preferred_element_type=jnp.float32)
        + par_ref[B20:B20 + 1, :])


def unilstm_fused(tok_tm, packed, *, S, Bp, H, Vp):
    """tok_tm: (S*Bp, 1) int32 time-major token ids. Returns (S*Bp, 4H) logits."""
    SB = S * Bp
    G = 4 * H
    kernel = functools.partial(_unilstm_kernel, S, Bp, H, Vp)
    vmem = pltpu.MemorySpace.VMEM
    return pl.pallas_call(
        kernel,
        out_shape=jax.ShapeDtypeStruct((SB, G), jnp.float32),
        in_specs=[pl.BlockSpec(memory_space=vmem),     # token ids
                  pl.BlockSpec(memory_space=vmem)],    # packed parameter slab
        out_specs=pl.BlockSpec(memory_space=vmem),
    )(tok_tm, packed)


# ----------------------------------------------------------------------------
# Full UniLSTM forward (mask select / label shift are plain-JAX glue)
# ----------------------------------------------------------------------------
@functools.partial(jax.jit, static_argnames=("H", "Vp", "n_classes"))
def unilstm_core(batch_sequence, packed, *, H, Vp, n_classes):
    B, S = batch_sequence.shape
    Bp = max(8, ((B + 7) // 8) * 8)        # pad batch to a full sublane group
    # pad extra batch rows with token 0 (padding_idx -> bias-only gx, rows dropped)
    tok = jnp.zeros((Bp, S), jnp.int32).at[:B, :].set(batch_sequence.astype(jnp.int32))
    tok_tm = tok.T.reshape(S * Bp, 1)                            # time-major ids

    logits_tm = unilstm_fused(tok_tm, packed, S=S, Bp=Bp, H=H, Vp=Vp)   # (S*Bp, 4H)
    G = 4 * H
    # time-major -> batch-major, drop padding rows and padded logit lanes
    logits_bm = jnp.transpose(logits_tm.reshape(S, Bp, G), (1, 0, 2))
    return logits_bm[:B, :, :n_classes].reshape(B * S, n_classes)


def unilstm_forward(batch_sequence, sequence_lengths, batch_label, packed,
                    *, H, Vp, n_classes):
    """Mirrors UniLSTM.forward -> (logits, labels) for non-padded positions."""
    logits_all = unilstm_core(batch_sequence, packed, H=H, Vp=Vp, n_classes=n_classes)
    B, S = batch_sequence.shape
    mask = (jnp.arange(S)[None, :] < sequence_lengths[:, None]).reshape(-1)
    # TODO(synk): data-dependent boolean compaction (dynamic row count) stays outside
    # jit; a production loss would consume padded logits + mask instead.
    logits = logits_all[mask]
    labels = batch_label.reshape(-1)[mask] - 1
    return logits, labels


# ----------------------------------------------------------------------------
# Parameter construction (synthetic, deterministic)
# ----------------------------------------------------------------------------
def make_params(key, vocab_size, E, H, C):
    ks = jax.random.split(key, 8)
    scale = 0.1
    word_emb = scale * jax.random.normal(ks[0], (vocab_size, E), jnp.float32)
    word_emb = word_emb.at[0].set(0.0)                  # padding_idx = 0
    w_ih = scale * jax.random.normal(ks[1], (E, 4 * H), jnp.float32)
    w_hh = scale * jax.random.normal(ks[2], (H, 4 * H), jnp.float32)
    # PyTorch LSTM has b_ih + b_hh; they always appear summed.
    b_lstm = scale * jax.random.normal(ks[3], (1, 4 * H), jnp.float32)
    w1 = scale * jax.random.normal(ks[4], (H, H // 2), jnp.float32)
    b1 = scale * jax.random.normal(ks[5], (1, H // 2), jnp.float32)
    w2 = scale * jax.random.normal(ks[6], (H // 2, C), jnp.float32)
    b2 = scale * jax.random.normal(ks[7], (1, C), jnp.float32)
    return dict(word_emb=word_emb, w_ih=w_ih, w_hh=w_hh, b_lstm=b_lstm,
                w1=w1, b1=b1, w2=w2, b2=b2)


def prepare_params(raw):
    """Fold embedding + input projection into one gather table and pack all
    parameters into a single (rows, 4H) f32 slab (one operand DMA total)."""
    E, G = raw["w_ih"].shape
    H = G // 4
    H2 = raw["w1"].shape[1]
    C = raw["w2"].shape[1]
    V = raw["word_emb"].shape[0]
    Vp = max(128, ((V + 127) // 128) * 128)   # one-hot gather lane width
    # NOTE: the in-kernel one-hot gather suits small vocabularies; a large vocab
    # would keep the row gather outside (or DMA-gather) instead.

    hi = jax.lax.Precision.HIGHEST
    gx_table = jnp.dot(raw["word_emb"], raw["w_ih"], precision=hi) + raw["b_lstm"]

    rows = Vp + 2 * H + 8 + G + 8
    slab = jnp.zeros((rows, G), jnp.float32)
    slab = slab.at[:V, :].set(gx_table)                               # gx table
    slab = slab.at[Vp:Vp + H, :].set(raw["w_hh"])                     # W_hh fused
    slab = slab.at[Vp + H:Vp + 2 * H, :H2].set(raw["w1"])             # W1 (lane-padded)
    slab = slab.at[Vp + 2 * H, :H2].set(raw["b1"][0])                 # b1 (row 0)
    slab = slab.at[Vp + 2 * H + 8:Vp + 2 * H + 8 + H2, :C].set(raw["w2"])  # W2 padded
    slab = slab.at[Vp + 2 * H + 8 + G, :C].set(raw["b2"][0])          # b2 (row 0)

    meta = dict(H=H, Vp=Vp, C=C)
    return slab, meta


# ----------------------------------------------------------------------------
# Pure-JAX reference (all positions), for a correctness sanity check
# ----------------------------------------------------------------------------
def unilstm_ref(batch_sequence, raw):
    hi = jax.lax.Precision.HIGHEST
    B, S = batch_sequence.shape
    H = raw["w_hh"].shape[0]
    emb = raw["word_emb"][batch_sequence]                   # (B, S, E)
    h = jnp.zeros((B, H), jnp.float32)
    c = jnp.zeros((B, H), jnp.float32)
    outs = []
    for t in range(S):
        g = (jnp.dot(emb[:, t, :], raw["w_ih"], precision=hi) + raw["b_lstm"]
             + jnp.dot(h, raw["w_hh"], precision=hi))
        i = jax.nn.sigmoid(g[:, 0 * H:1 * H])
        f = jax.nn.sigmoid(g[:, 1 * H:2 * H])
        gg = jnp.tanh(g[:, 2 * H:3 * H])
        o = jax.nn.sigmoid(g[:, 3 * H:4 * H])
        c = f * c + i * gg
        h = o * jnp.tanh(c)
        outs.append(h)
    h_all = jnp.stack(outs, axis=1).reshape(B * S, H)
    z = jnp.tanh(jnp.dot(h_all, raw["w1"], precision=hi) + raw["b1"])
    return jnp.dot(z, raw["w2"], precision=hi) + raw["b2"]


# ----------------------------------------------------------------------------
if __name__ == "__main__":
    B, S = 2, 8
    VOCAB, E, H, C = 50, 32, 32, 2

    key = jax.random.PRNGKey(0)
    k_tok, k_lab, k_par = jax.random.split(key, 3)

    sequence_lengths = jnp.array([8, 5], dtype=jnp.int32)
    tokens = jax.random.randint(k_tok, (B, S), 1, VOCAB, dtype=jnp.int32)
    pos = jnp.arange(S)[None, :]
    batch_sequence = jnp.where(pos < sequence_lengths[:, None], tokens, 0)
    batch_label = jax.random.randint(k_lab, (B, S), 1, C + 1, dtype=jnp.int32)

    raw = make_params(k_par, VOCAB, E, H, C)
    packed, meta = prepare_params(raw)

    logits, labels = unilstm_forward(
        batch_sequence, sequence_lengths, batch_label, packed,
        H=meta["H"], Vp=meta["Vp"], n_classes=C)
    jax.block_until_ready(logits)
    jax.block_until_ready(labels)

    # correctness sanity check against the pure-JAX reference (all positions)
    logits_all = unilstm_core(batch_sequence, packed,
                              H=meta["H"], Vp=meta["Vp"], n_classes=C)
    ref_all = unilstm_ref(batch_sequence, raw)
    max_err = float(jnp.max(jnp.abs(logits_all - ref_all)))
    assert jnp.allclose(logits_all, ref_all, atol=5e-3, rtol=1e-2), max_err

    n_valid = int(sequence_lengths.sum())
    assert logits.shape == (n_valid, C)
    assert labels.shape == (n_valid,)
    print("KERNEL_OK")
</pallas_src>

<mosaic_0001>
module attributes {stable_mosaic.version = 11 : i64} {
  func.func @_unilstm_kernel(%arg0: memref<64x1xi32, #tpu.memory_space<vmem>>, %arg1: memref<336x128xf32, #tpu.memory_space<vmem>>, %arg2: memref<64x128xf32, #tpu.memory_space<vmem>>) attributes {dimension_semantics = [], scalar_prefetch = 0 : i64, scratch_operands = 0 : i64, tpu.core_type = #tpu.core_type<tc>} {
    %c0 = arith.constant 0 : index
    %c0_0 = arith.constant 0 : index
    %0 = vector.load %arg0[%c0, %c0_0] : memref<64x1xi32, #tpu.memory_space<vmem>>, vector<64x1xi32>
    %1 = tpu.iota {dimensions = array<i32: 1>} : vector<64x128xi32>
    %2 = vector.broadcast %0 : vector<64x1xi32> to vector<64x128xi32>
    %3 = arith.cmpi eq, %1, %2 : vector<64x128xi32>
    %4 = arith.extui %3 : vector<64x128xi1> to vector<64x128xi32>
    %5 = arith.sitofp %4 : vector<64x128xi32> to vector<64x128xf32>
    %c0_1 = arith.constant 0 : index
    %c0_2 = arith.constant 0 : index
    %6 = vector.load %arg1[%c0_1, %c0_2] : memref<336x128xf32, #tpu.memory_space<vmem>>, vector<128x128xf32>
    %cst = arith.constant dense<0.000000e+00> : vector<64x128xf32>
    %7 = tpu.matmul %5, %6, %cst {dimension_numbers = #tpu.dot_dimension_numbers<[1], [0], [0], [1], [0, 0, 1, 1], [], []>} : vector<64x128xf32>, vector<128x128xf32>, vector<64x128xf32> -> vector<64x128xf32>
    %c128 = arith.constant 128 : index
    %c0_3 = arith.constant 0 : index
    %8 = vector.load %arg1[%c128, %c0_3] : memref<336x128xf32, #tpu.memory_space<vmem>>, vector<32x128xf32>
    %9 = tpu.iota {dimensions = array<i32: 1>} : vector<8x128xi32>
    %c64_i32 = arith.constant 64 : i32
    %10 = vector.broadcast %c64_i32 : i32 to vector<8x128xi32>
    %11 = arith.cmpi sge, %9, %10 : vector<8x128xi32>
    %c96_i32 = arith.constant 96 : i32
    %12 = vector.broadcast %c96_i32 : i32 to vector<8x128xi32>
    %13 = arith.cmpi slt, %9, %12 : vector<8x128xi32>
    %14 = arith.andi %11, %13 : vector<8x128xi1>
    %cst_4 = arith.constant 0.000000e+00 : f32
    %15 = vector.broadcast %cst_4 : f32 to vector<8x32xf32>
    %cst_5 = arith.constant 0.000000e+00 : f32
    %16 = vector.broadcast %cst_5 : f32 to vector<8x32xf32>
    %17 = vector.extract_strided_slice %7 {offsets = [0, 0], sizes = [8, 128], strides = [1, 1]} : vector<64x128xf32> to vector<8x128xf32>
    %cst_6 = arith.constant dense<0.000000e+00> : vector<8x128xf32>
    %18 = tpu.matmul %15, %8, %cst_6 {dimension_numbers = #tpu.dot_dimension_numbers<[1], [0], [0], [1], [0, 0, 1, 1], [], []>} : vector<8x32xf32>, vector<32x128xf32>, vector<8x128xf32> -> vector<8x128xf32>
    %19 = arith.addf %17, %18 : vector<8x128xf32>
    %20 = math.tanh %19 : vector<8x128xf32>
    %21 = arith.negf %19 : vector<8x128xf32>
    %22 = math.exp %21 : vector<8x128xf32>
    %cst_7 = arith.constant 1.000000e+00 : f32
    %23 = vector.broadcast %cst_7 : f32 to vector<8x128xf32>
    %24 = arith.addf %23, %22 : vector<8x128xf32>
    %25 = arith.divf %23, %24 : vector<8x128xf32>
    %26 = arith.select %14, %20, %25 : vector<8x128xi1>, vector<8x128xf32>
    %27 = vector.extract_strided_slice %26 {offsets = [0, 0], sizes = [8, 32], strides = [1, 1]} : vector<8x128xf32> to vector<8x32xf32>
    %28 = vector.extract_strided_slice %26 {offsets = [0, 32], sizes = [8, 32], strides = [1, 1]} : vector<8x128xf32> to vector<8x32xf32>
    %29 = vector.extract_strided_slice %26 {offsets = [0, 64], sizes = [8, 32], strides = [1, 1]} : vector<8x128xf32> to vector<8x32xf32>
    %30 = vector.extract_strided_slice %26 {offsets = [0, 96], sizes = [8, 32], strides = [1, 1]} : vector<8x128xf32> to vector<8x32xf32>
    %31 = arith.mulf %28, %16 : vector<8x32xf32>
    %32 = arith.mulf %27, %29 : vector<8x32xf32>
    %33 = arith.addf %31, %32 : vector<8x32xf32>
    %34 = math.tanh %33 : vector<8x32xf32>
    %35 = arith.mulf %30, %34 : vector<8x32xf32>
    %36 = vector.extract_strided_slice %7 {offsets = [8, 0], sizes = [8, 128], strides = [1, 1]} : vector<64x128xf32> to vector<8x128xf32>
    %cst_8 = arith.constant dense<0.000000e+00> : vector<8x128xf32>
    %37 = tpu.matmul %35, %8, %cst_8 {dimension_numbers = #tpu.dot_dimension_numbers<[1], [0], [0], [1], [0, 0, 1, 1], [], []>} : vector<8x32xf32>, vector<32x128xf32>, vector<8x128xf32> -> vector<8x128xf32>
    %38 = arith.addf %36, %37 : vector<8x128xf32>
    %39 = math.tanh %38 : vector<8x128xf32>
    %40 = arith.negf %38 : vector<8x128xf32>
    %41 = math.exp %40 : vector<8x128xf32>
    %cst_9 = arith.constant 1.000000e+00 : f32
    %42 = vector.broadcast %cst_9 : f32 to vector<8x128xf32>
    %43 = arith.addf %42, %41 : vector<8x128xf32>
    %44 = arith.divf %42, %43 : vector<8x128xf32>
    %45 = arith.select %14, %39, %44 : vector<8x128xi1>, vector<8x128xf32>
    %46 = vector.extract_strided_slice %45 {offsets = [0, 0], sizes = [8, 32], strides = [1, 1]} : vector<8x128xf32> to vector<8x32xf32>
    %47 = vector.extract_strided_slice %45 {offsets = [0, 32], sizes = [8, 32], strides = [1, 1]} : vector<8x128xf32> to vector<8x32xf32>
    %48 = vector.extract_strided_slice %45 {offsets = [0, 64], sizes = [8, 32], strides = [1, 1]} : vector<8x128xf32> to vector<8x32xf32>
    %49 = vector.extract_strided_slice %45 {offsets = [0, 96], sizes = [8, 32], strides = [1, 1]} : vector<8x128xf32> to vector<8x32xf32>
    %50 = arith.mulf %47, %33 : vector<8x32xf32>
    %51 = arith.mulf %46, %48 : vector<8x32xf32>
    %52 = arith.addf %50, %51 : vector<8x32xf32>
    %53 = math.tanh %52 : vector<8x32xf32>
    %54 = arith.mulf %49, %53 : vector<8x32xf32>
    %55 = vector.extract_strided_slice %7 {offsets = [16, 0], sizes = [8, 128], strides = [1, 1]} : vector<64x128xf32> to vector<8x128xf32>
    %cst_10 = arith.constant dense<0.000000e+00> : vector<8x128xf32>
    %56 = tpu.matmul %54, %8, %cst_10 {dimension_numbers = #tpu.dot_dimension_numbers<[1], [0], [0], [1], [0, 0, 1, 1], [], []>} : vector<8x32xf32>, vector<32x128xf32>, vector<8x128xf32> -> vector<8x128xf32>
    %57 = arith.addf %55, %56 : vector<8x128xf32>
    %58 = math.tanh %57 : vector<8x128xf32>
    %59 = arith.negf %57 : vector<8x128xf32>
    %60 = math.exp %59 : vector<8x128xf32>
    %cst_11 = arith.constant 1.000000e+00 : f32
    %61 = vector.broadcast %cst_11 : f32 to vector<8x128xf32>
    %62 = arith.addf %61, %60 : vector<8x128xf32>
    %63 = arith.divf %61, %62 : vector<8x128xf32>
    %64 = arith.select %14, %58, %63 : vector<8x128xi1>, vector<8x128xf32>
    %65 = vector.extract_strided_slice %64 {offsets = [0, 0], sizes = [8, 32], strides = [1, 1]} : vector<8x128xf32> to vector<8x32xf32>
    %66 = vector.extract_strided_slice %64 {offsets = [0, 32], sizes = [8, 32], strides = [1, 1]} : vector<8x128xf32> to vector<8x32xf32>
    %67 = vector.extract_strided_slice %64 {offsets = [0, 64], sizes = [8, 32], strides = [1, 1]} : vector<8x128xf32> to vector<8x32xf32>
    %68 = vector.extract_strided_slice %64 {offsets = [0, 96], sizes = [8, 32], strides = [1, 1]} : vector<8x128xf32> to vector<8x32xf32>
    %69 = arith.mulf %66, %52 : vector<8x32xf32>
    %70 = arith.mulf %65, %67 : vector<8x32xf32>
    %71 = arith.addf %69, %70 : vector<8x32xf32>
    %72 = math.tanh %71 : vector<8x32xf32>
    %73 = arith.mulf %68, %72 : vector<8x32xf32>
    %74 = vector.extract_strided_slice %7 {offsets = [24, 0], sizes = [8, 128], strides = [1, 1]} : vector<64x128xf32> to vector<8x128xf32>
    %cst_12 = arith.constant dense<0.000000e+00> : vector<8x128xf32>
    %75 = tpu.matmul %73, %8, %cst_12 {dimension_numbers = #tpu.dot_dimension_numbers<[1], [0], [0], [1], [0, 0, 1, 1], [], []>} : vector<8x32xf32>, vector<32x128xf32>, vector<8x128xf32> -> vector<8x128xf32>
    %76 = arith.addf %74, %75 : vector<8x128xf32>
    %77 = math.tanh %76 : vector<8x128xf32>
    %78 = arith.negf %76 : vector<8x128xf32>
    %79 = math.exp %78 : vector<8x128xf32>
    %cst_13 = arith.constant 1.000000e+00 : f32
    %80 = vector.broadcast %cst_13 : f32 to vector<8x128xf32>
    %81 = arith.addf %80, %79 : vector<8x128xf32>
    %82 = arith.divf %80, %81 : vector<8x128xf32>
    %83 = arith.select %14, %77, %82 : vector<8x128xi1>, vector<8x128xf32>
    %84 = vector.extract_strided_slice %83 {offsets = [0, 0], sizes = [8, 32], strides = [1, 1]} : vector<8x128xf32> to vector<8x32xf32>
    %85 = vector.extract_strided_slice %83 {offsets = [0, 32], sizes = [8, 32], strides = [1, 1]} : vector<8x128xf32> to vector<8x32xf32>
    %86 = vector.extract_strided_slice %83 {offsets = [0, 64], sizes = [8, 32], strides = [1, 1]} : vector<8x128xf32> to vector<8x32xf32>
    %87 = vector.extract_strided_slice %83 {offsets = [0, 96], sizes = [8, 32], strides = [1, 1]} : vector<8x128xf32> to vector<8x32xf32>
    %88 = arith.mulf %85, %71 : vector<8x32xf32>
    %89 = arith.mulf %84, %86 : vector<8x32xf32>
    %90 = arith.addf %88, %89 : vector<8x32xf32>
    %91 = math.tanh %90 : vector<8x32xf32>
    %92 = arith.mulf %87, %91 : vector<8x32xf32>
    %93 = vector.extract_strided_slice %7 {offsets = [32, 0], sizes = [8, 128], strides = [1, 1]} : vector<64x128xf32> to vector<8x128xf32>
    %cst_14 = arith.constant dense<0.000000e+00> : vector<8x128xf32>
    %94 = tpu.matmul %92, %8, %cst_14 {dimension_numbers = #tpu.dot_dimension_numbers<[1], [0], [0], [1], [0, 0, 1, 1], [], []>} : vector<8x32xf32>, vector<32x128xf32>, vector<8x128xf32> -> vector<8x128xf32>
    %95 = arith.addf %93, %94 : vector<8x128xf32>
    %96 = math.tanh %95 : vector<8x128xf32>
    %97 = arith.negf %95 : vector<8x128xf32>
    %98 = math.exp %97 : vector<8x128xf32>
    %cst_15 = arith.constant 1.000000e+00 : f32
    %99 = vector.broadcast %cst_15 : f32 to vector<8x128xf32>
    %100 = arith.addf %99, %98 : vector<8x128xf32>
    %101 = arith.divf %99, %100 : vector<8x128xf32>
    %102 = arith.select %14, %96, %101 : vector<8x128xi1>, vector<8x128xf32>
    %103 = vector.extract_strided_slice %102 {offsets = [0, 0], sizes = [8, 32], strides = [1, 1]} : vector<8x128xf32> to vector<8x32xf32>
    %104 = vector.extract_strided_slice %102 {offsets = [0, 32], sizes = [8, 32], strides = [1, 1]} : vector<8x128xf32> to vector<8x32xf32>
    %105 = vector.extract_strided_slice %102 {offsets = [0, 64], sizes = [8, 32], strides = [1, 1]} : vector<8x128xf32> to vector<8x32xf32>
    %106 = vector.extract_strided_slice %102 {offsets = [0, 96], sizes = [8, 32], strides = [1, 1]} : vector<8x128xf32> to vector<8x32xf32>
    %107 = arith.mulf %104, %90 : vector<8x32xf32>
    %108 = arith.mulf %103, %105 : vector<8x32xf32>
    %109 = arith.addf %107, %108 : vector<8x32xf32>
    %110 = math.tanh %109 : vector<8x32xf32>
    %111 = arith.mulf %106, %110 : vector<8x32xf32>
    %112 = vector.extract_strided_slice %7 {offsets = [40, 0], sizes = [8, 128], strides = [1, 1]} : vector<64x128xf32> to vector<8x128xf32>
    %cst_16 = arith.constant dense<0.000000e+00> : vector<8x128xf32>
    %113 = tpu.matmul %111, %8, %cst_16 {dimension_numbers = #tpu.dot_dimension_numbers<[1], [0], [0], [1], [0, 0, 1, 1], [], []>} : vector<8x32xf32>, vector<32x128xf32>, vector<8x128xf32> -> vector<8x128xf32>
    %114 = arith.addf %112, %113 : vector<8x128xf32>
    %115 = math.tanh %114 : vector<8x128xf32>
    %116 = arith.negf %114 : vector<8x128xf32>
    %117 = math.exp %116 : vector<8x128xf32>
    %cst_17 = arith.constant 1.000000e+00 : f32
    %118 = vector.broadcast %cst_17 : f32 to vector<8x128xf32>
    %119 = arith.addf %118, %117 : vector<8x128xf32>
    %120 = arith.divf %118, %119 : vector<8x128xf32>
    %121 = arith.select %14, %115, %120 : vector<8x128xi1>, vector<8x128xf32>
    %122 = vector.extract_strided_slice %121 {offsets = [0, 0], sizes = [8, 32], strides = [1, 1]} : vector<8x128xf32> to vector<8x32xf32>
    %123 = vector.extract_strided_slice %121 {offsets = [0, 32], sizes = [8, 32], strides = [1, 1]} : vector<8x128xf32> to vector<8x32xf32>
    %124 = vector.extract_strided_slice %121 {offsets = [0, 64], sizes = [8, 32], strides = [1, 1]} : vector<8x128xf32> to vector<8x32xf32>
    %125 = vector.extract_strided_slice %121 {offsets = [0, 96], sizes = [8, 32], strides = [1, 1]} : vector<8x128xf32> to vector<8x32xf32>
    %126 = arith.mulf %123, %109 : vector<8x32xf32>
    %127 = arith.mulf %122, %124 : vector<8x32xf32>
    %128 = arith.addf %126, %127 : vector<8x32xf32>
    %129 = math.tanh %128 : vector<8x32xf32>
    %130 = arith.mulf %125, %129 : vector<8x32xf32>
    %131 = vector.extract_strided_slice %7 {offsets = [48, 0], sizes = [8, 128], strides = [1, 1]} : vector<64x128xf32> to vector<8x128xf32>
    %cst_18 = arith.constant dense<0.000000e+00> : vector<8x128xf32>
    %132 = tpu.matmul %130, %8, %cst_18 {dimension_numbers = #tpu.dot_dimension_numbers<[1], [0], [0], [1], [0, 0, 1, 1], [], []>} : vector<8x32xf32>, vector<32x128xf32>, vector<8x128xf32> -> vector<8x128xf32>
    %133 = arith.addf %131, %132 : vector<8x128xf32>
    %134 = math.tanh %133 : vector<8x128xf32>
    %135 = arith.negf %133 : vector<8x128xf32>
    %136 = math.exp %135 : vector<8x128xf32>
    %cst_19 = arith.constant 1.000000e+00 : f32
    %137 = vector.broadcast %cst_19 : f32 to vector<8x128xf32>
    %138 = arith.addf %137, %136 : vector<8x128xf32>
    %139 = arith.divf %137, %138 : vector<8x128xf32>
    %140 = arith.select %14, %134, %139 : vector<8x128xi1>, vector<8x128xf32>
    %141 = vector.extract_strided_slice %140 {offsets = [0, 0], sizes = [8, 32], strides = [1, 1]} : vector<8x128xf32> to vector<8x32xf32>
    %142 = vector.extract_strided_slice %140 {offsets = [0, 32], sizes = [8, 32], strides = [1, 1]} : vector<8x128xf32> to vector<8x32xf32>
    %143 = vector.extract_strided_slice %140 {offsets = [0, 64], sizes = [8, 32], strides = [1, 1]} : vector<8x128xf32> to vector<8x32xf32>
    %144 = vector.extract_strided_slice %140 {offsets = [0, 96], sizes = [8, 32], strides = [1, 1]} : vector<8x128xf32> to vector<8x32xf32>
    %145 = arith.mulf %142, %128 : vector<8x32xf32>
    %146 = arith.mulf %141, %143 : vector<8x32xf32>
    %147 = arith.addf %145, %146 : vector<8x32xf32>
    %148 = math.tanh %147 : vector<8x32xf32>
    %149 = arith.mulf %144, %148 : vector<8x32xf32>
    %150 = vector.extract_strided_slice %7 {offsets = [56, 0], sizes = [8, 128], strides = [1, 1]} : vector<64x128xf32> to vector<8x128xf32>
    %cst_20 = arith.constant dense<0.000000e+00> : vector<8x128xf32>
    %151 = tpu.matmul %149, %8, %cst_20 {dimension_numbers = #tpu.dot_dimension_numbers<[1], [0], [0], [1], [0, 0, 1, 1], [], []>} : vector<8x32xf32>, vector<32x128xf32>, vector<8x128xf32> -> vector<8x128xf32>
    %152 = arith.addf %150, %151 : vector<8x128xf32>
    %153 = math.tanh %152 : vector<8x128xf32>
    %154 = arith.negf %152 : vector<8x128xf32>
    %155 = math.exp %154 : vector<8x128xf32>
    %cst_21 = arith.constant 1.000000e+00 : f32
    %156 = vector.broadcast %cst_21 : f32 to vector<8x128xf32>
    %157 = arith.addf %156, %155 : vector<8x128xf32>
    %158 = arith.divf %156, %157 : vector<8x128xf32>
    %159 = arith.select %14, %153, %158 : vector<8x128xi1>, vector<8x128xf32>
    %160 = vector.extract_strided_slice %159 {offsets = [0, 0], sizes = [8, 32], strides = [1, 1]} : vector<8x128xf32> to vector<8x32xf32>
    %161 = vector.extract_strided_slice %159 {offsets = [0, 32], sizes = [8, 32], strides = [1, 1]} : vector<8x128xf32> to vector<8x32xf32>
    %162 = vector.extract_strided_slice %159 {offsets = [0, 64], sizes = [8, 32], strides = [1, 1]} : vector<8x128xf32> to vector<8x32xf32>
    %163 = vector.extract_strided_slice %159 {offsets = [0, 96], sizes = [8, 32], strides = [1, 1]} : vector<8x128xf32> to vector<8x32xf32>
    %164 = arith.mulf %161, %147 : vector<8x32xf32>
    %165 = arith.mulf %160, %162 : vector<8x32xf32>
    %166 = arith.addf %164, %165 : vector<8x32xf32>
    %167 = math.tanh %166 : vector<8x32xf32>
    %168 = arith.mulf %163, %167 : vector<8x32xf32>
    %169 = tpu.concatenate %35, %54, %73, %92, %111, %130, %149, %168 in 0 : vector<8x32xf32>, vector<8x32xf32>, vector<8x32xf32>, vector<8x32xf32>, vector<8x32xf32>, vector<8x32xf32>, vector<8x32xf32>, vector<8x32xf32> -> vector<64x32xf32>
    %c160 = arith.constant 160 : index
    %c0_22 = arith.constant 0 : index
    %170 = vector.load %arg1[%c160, %c0_22] : memref<336x128xf32, #tpu.memory_space<vmem>>, vector<32x128xf32>
    %cst_23 = arith.constant dense<0.000000e+00> : vector<64x128xf32>
    %171 = tpu.matmul %169, %170, %cst_23 {dimension_numbers = #tpu.dot_dimension_numbers<[1], [0], [0], [1], [0, 0, 1, 1], [], []>} : vector<64x32xf32>, vector<32x128xf32>, vector<64x128xf32> -> vector<64x128xf32>
    %c192 = arith.constant 192 : index
    %c0_24 = arith.constant 0 : index
    %172 = vector.load %arg1[%c192, %c0_24] : memref<336x128xf32, #tpu.memory_space<vmem>>, vector<1x128xf32>
    %173 = vector.broadcast %172 : vector<1x128xf32> to vector<64x128xf32>
    %174 = arith.addf %171, %173 : vector<64x128xf32>
    %175 = math.tanh %174 : vector<64x128xf32>
    %c200 = arith.constant 200 : index
    %c0_25 = arith.constant 0 : index
    %176 = vector.load %arg1[%c200, %c0_25] : memref<336x128xf32, #tpu.memory_space<vmem>>, vector<128x128xf32>
    %cst_26 = arith.constant dense<0.000000e+00> : vector<64x128xf32>
    %177 = tpu.matmul %175, %176, %cst_26 {dimension_numbers = #tpu.dot_dimension_numbers<[1], [0], [0], [1], [0, 0, 1, 1], [], []>} : vector<64x128xf32>, vector<128x128xf32>, vector<64x128xf32> -> vector<64x128xf32>
    %c328 = arith.constant 328 : index
    %c0_27 = arith.constant 0 : index
    %178 = vector.load %arg1[%c328, %c0_27] : memref<336x128xf32, #tpu.memory_space<vmem>>, vector<1x128xf32>
    %179 = vector.broadcast %178 : vector<1x128xf32> to vector<64x128xf32>
    %180 = arith.addf %177, %179 : vector<64x128xf32>
    %c0_28 = arith.constant 0 : index
    %c0_29 = arith.constant 0 : index
    %181 = vector.load %arg2[%c0_28, %c0_29] : memref<64x128xf32, #tpu.memory_space<vmem>>, vector<64x128xf32>
    tpu.vector_store %arg2[%c0_28, %c0_29], %180 {strides = array<i32>} : memref<64x128xf32, #tpu.memory_space<vmem>>, vector<64x128xf32>,
    return
  }
}

</mosaic_0001>

<bundles_post_ra>
// kernel: unilstm_core.1
= control target key start
LH: loop header
LB: loop body
LE: loop exit
PB: predicated region body
PF: predicated region fallthrough
CT: control target
= control target key end

     0   :  { %7 = vsyncpa [#allocation3], 0  ;;  %s1734_s9 = smov [#allocation2]   ;;  %s2026_s0 = inlined_call_operand.vmem [shape: s32[64,1], index: 0, kind: input, shape index: {}]   ;;  %s2027_s1 = inlined_call_operand.hbm [shape: f32[336,128], index: 1, kind: input, shape index: {}]   ;;  %s2028_s2 = inlined_call_operand.vmem [shape: f32[64,128], index: 2, kind: output, shape index: {}]  }
   0x1   :  { %s15_s10 = sshll.u32 %s1734_s9, 4  ;;  %s16_s10 = int_to_ptr.vmem [resolvable:$true] %s15_s10 }
   0x2   :  { %s1720_s11 = scalar_lea.vmem %s16_s10, 5376  ;;  %p1725_p1 = scmp.lt.s32.totalorder %s16_s10, %s16_s10 }
   0x3   :  { %p1721_p0 = scmp.ne.s32.totalorder %s16_s10, %s1720_s11  ;;  %p1726_p2 = scmp.lt.s32.totalorder %s1720_s11, %s1720_s11 }
   0x5   :  { %p1727_p3 = por %p1726_p2, %p1725_p1 }
   0x7   :  { %p1728_p4 = pnand %p1727_p3, %p1721_p0 }
   0x9   :  { %1731 = shalt.err (!%p1728_p4)
}
   0xa   :  { %s1735_s12 = smov 128   ;;  %s1736_s13 = smov 8  }
   0xb   :  { %21 = dma.hbm_to_vmem [thread:$0]  %s2027_s1, 5376, %s16_s10, [#allocation3], %s1735_s12, %s1735_s12, %s1736_s13  }
   0xc   :  { %1732 = dma.done.wait [#allocation3], 5376  }
   0xd   :  { %1733 = vsyncadd [#allocation3], 4294961920  ;;  %v1737_v0 = vmov 0   ;;  %v1738_v1 = vmov 0.0   ;;  %v25_v2 = vld [vmem:[%s2026_s0] sm:$0xff]  ;;  %v98_v3 = vld [vmem:[#allocation2 + $0x78] sm:$0xff]  ;;  %v33_v24 = vlaneseq }
   0xe   :  { %1630 = vset.pattern.permute.xlu0 %v1737_v0  ;;  %1469 = vmatprep.subr.mxu1 %v1738_v1  ;;  %v97_v4 = vld [vmem:[#allocation2 + $0x70] sm:$0xff]  ;;  %v26_v5 = vld [vmem:[%s2026_s0 + $0x8] sm:$0xff]  ;;  %vm1739_vm0 = vmmov 0   ;;  %v95_v7 = vld [vmem:[#allocation2 + $0x60] sm:$0xff]  ;;  %v1740_v27 = vmov 1.0   ;;  %s1741_s1 = smov 64  }
   0xf   :  { %1631 = vset.pattern.permute.xlu1 %v1737_v0  ;;  %36 = vperm.xlu0 %1630, %v25_v2   ;;  %v96_v6 = vld [vmem:[#allocation2 + $0x68] sm:$0xff]  ;;  %v1770_v8 = vld [vmem:[#allocation2 + $0x98] sm:$0xff]  ;;  %v1772_v9 = vld [vmem:[#allocation2 + $0x90] sm:$0xff]  ;;  %v1797_v25 = vand.u32 127, %v33_v24  ;;  %s1742_s20 = smov 32   ;;  %vm211_vm6 = vcmask 261120  }
  0x10   :  { %1425 = vmatprep.subr.mxu0 %v98_v3  ;;  %1477 = vmatprep.mubr.msk.f32.mxu1 %vm1739_vm0, %v1738_v1  ;;  %v94_v10 = vld [vmem:[#allocation2 + $0x58] sm:$0xff]  ;;  %v1776_v11 = vld [vmem:[#allocation2 + $0x88] sm:$0xff]  ;;  %v93_v12 = vld [vmem:[#allocation2 + $0x50] sm:$0xff] }
  0x11   :  { %1426 = vmatpush3.msra.mxu0 %v98_v3  ;;  %1470 = vmatpush3.msra.mxu1 %v1770_v8  ;;  %v1780_v13 = vld [vmem:[#allocation2 + $0x80] sm:$0xff]  ;;  %v92_v14 = vld [vmem:[#allocation2 + $0x48] sm:$0xff]  ;;  %v90_v16 = vld [vmem:[#allocation2 + $0x38] sm:$0xff]  ;;  %vm208_vm3 = vcmp.ge.s32.totalorder %v1797_v25, 64  ;;  %vm209_vm4 = vcmp.lt.s32.totalorder %v1797_v25, 96 }
  0x12   :  { %1427 = vmatprep.subr.mxu0 %v97_v4  ;;  %1471 = vmatprep.subr.mxu1 %v1738_v1  ;;  %v91_v15 = vld [vmem:[#allocation2 + $0x40] sm:$0xff]  ;;  %v89_v17 = vld [vmem:[#allocation2 + $0x30] sm:$0xff]  ;;  %v88_v18 = vld [vmem:[#allocation2 + $0x28] sm:$0xff] }
  0x13   :  { %1428 = vmatpush3.msra.mxu0 %v97_v4  ;;  %39 = vperm.xlu0 %1630, %v26_v5   ;;  %v87_v19 = vld [vmem:[#allocation2 + $0x20] sm:$0xff]  ;;  %v86_v20 = vld [vmem:[#allocation2 + $0x18] sm:$0xff]  ;;  %v85_v21 = vld [vmem:[#allocation2 + $0x10] sm:$0xff] }
  0x14   :  { %1429 = vmatprep.subr.mxu0 %v96_v6  ;;  %1472 = vmatpush3.msra.mxu1 %v1772_v9  ;;  %v84_v22 = vld [vmem:[#allocation2 + $0x8] sm:$0xff]  ;;  %v83_v23 = vld [vmem:[#allocation2] sm:$0xff]  ;;  %vm1805_vm5 = vmand %vm208_vm3, %vm209_vm4 }
  0x15   :  { %1430 = vmatpush3.msra.mxu0 %v96_v6  ;;  %1473 = vmatprep.subr.mxu1 %v1738_v1  ;;  %v27_v61 = vld [vmem:[%s2026_s0 + $0x10] sm:$0xff]  ;;  %v28_v4 = vld [vmem:[%s2026_s0 + $0x18] sm:$0xff] }
  0x16   :  { %1431 = vmatprep.subr.mxu0 %v95_v7  ;;  %1474 = vmatpush3.msra.mxu1 %v1776_v11 }
  0x17   :  { %1432 = vmatpush3.msra.mxu0 %v95_v7  ;;  %1475 = vmatprep.subr.mxu1 %v1738_v1 }
  0x18   :  { %1433 = vmatprep.subr.mxu0 %v94_v10  ;;  %1476 = vmatpush3.msra.mxu1 %v1780_v13 }
  0x19   :  { %1434 = vmatpush3.msra.mxu0 %v94_v10  ;;  %1478 = vmatmul.mubr.f32.vlgmr.msra.gmra.mxu1 %v1738_v1 }
  0x1a   :  { %1435 = vmatprep.subr.mxu0 %v93_v12  ;;  %1480 = vmatprep.subr.mxu1 %v1738_v1 }
  0x1b   :  { %1436 = vmatpush3.msra.mxu0 %v93_v12  ;;  %1481 = vmatpush3.msra.mxu1 %v1770_v8 }
  0x1c   :  { %1437 = vmatprep.subr.mxu0 %v92_v14  ;;  %1482 = vmatprep.subr.mxu1 %v1738_v1 }
  0x1d   :  { %1438 = vmatpush3.msra.mxu0 %v92_v14  ;;  %1483 = vmatpush3.msra.mxu1 %v1772_v9 }
  0x1e   :  { %1439 = vmatprep.subr.mxu0 %v91_v15  ;;  %1484 = vmatprep.subr.mxu1 %v1738_v1 }
  0x1f   :  { %1440 = vmatpush3.msra.mxu0 %v91_v15  ;;  %1485 = vmatpush3.msra.mxu1 %v1776_v11 }
  0x20   :  { %1441 = vmatprep.subr.mxu0 %v90_v16  ;;  %1486 = vmatprep.subr.mxu1 %v1738_v1 }
  0x21   :  { %1442 = vmatpush3.msra.mxu0 %v90_v16  ;;  %1487 = vmatpush3.msra.mxu1 %v1780_v13 }
  0x22   :  { %1443 = vmatprep.subr.mxu0 %v89_v17  ;;  %1488 = vmatprep.mubr.msk.f32.mxu1 %vm1739_vm0, %v1738_v1 }
  0x23   :  { %1444 = vmatpush3.msra.mxu0 %v89_v17  ;;  %1491 = vmatprep.subr.mxu1 %v1738_v1 }
  0x24   :  { %1445 = vmatprep.subr.mxu0 %v88_v18 }
  0x25   :  { %1446 = vmatpush3.msra.mxu0 %v88_v18 }
  0x26   :  { %1447 = vmatprep.subr.mxu0 %v87_v19 }
  0x27   :  { %1448 = vmatpush3.msra.mxu0 %v87_v19 }
  0x28   :  { %1449 = vmatprep.subr.mxu0 %v86_v20 }
  0x29   :  { %1450 = vmatpush3.msra.mxu0 %v86_v20 }
  0x2a   :  { %1451 = vmatprep.subr.mxu0 %v85_v21 }
  0x2b   :  { %1452 = vmatpush3.msra.mxu0 %v85_v21 }
  0x2c   :  { %1453 = vmatprep.subr.mxu0 %v84_v22 }
  0x2d   :  { %1454 = vmatpush3.msra.mxu0 %v84_v22 }
  0x2e   :  { %1455 = vmatprep.subr.mxu0 %v83_v23 }
  0x2f   :  { %1456 = vmatpush3.msra.mxu0 %v83_v23 }
  0x8a   :  { %v37_v26 = vpop.permute.xlu0 %36 }
  0x8b   :  { %vm59_vm1 = vcmp.eq.s32.totalorder %v1797_v25, %v37_v26 }
  0x8c   :  { %1457 = vmatprep.mubr.msk.f32.mxu0 %vm59_vm1, %v1740_v27 }
  0x8e   :  { %v40_v28 = vpop.permute.xlu0 %39 }
  0x8f   :  { %vm60_vm2 = vcmp.eq.s32.totalorder %v1797_v25, %v40_v28 }
  0x90   :  { %1458 = vmatmul.mubr.msk.f32.vlgmr.msra.gmra.mxu0 %vm60_vm2, %v1740_v27 }
  0xd9   :  { %v281_v29 = vpop.f32.mrf.mxu1 }
  0xdb   :  { %v1479_v30 = vpop.f32.mrf.mxu1 }
 0x150   :  { %v1459_v31 = vpop.f32.mrf.mxu0 }
 0x152   :  { %v165_v32 = vpop.f32.mrf.mxu0 }
 0x153   :  { %v285_v33 = vadd.f32 %v281_v29, %v165_v32 }
 0x155   :  { %v1300_v34 = vmul.f32 -1.442695, %v285_v33 }
 0x157   :  { %1632 = vpow2.f32 %v1300_v34 }
 0x158   :  { %1634 = vtanh.f32 %v285_v33 }
 0x164   :  { %v1633_v35 = vpop.eup %1632 }
 0x165   :  { %v290_v36 = vadd.f32 1.0, %v1633_v35  ;;  %v1635_v38 = vpop.eup %1634 }
 0x167   :  { %1636 = vrcp.f32 %v290_v36 }
 0x174   :  { %v1637_v39 = vpop.eup %1636 }
 0x175   :  { %v293_v40 = vsel %vm1805_vm5, %v1635_v38, %v1637_v39 }
 0x176   :  { %296 = vrot.lane.b32.xlu1 %v293_v40, %s1741_s1  ;;  %v294_v43 = vmul.f32 0.0, %v293_v40 }
 0x1e8   :  { %v297_v41 = vpop.permute.xlu1 %296 }
 0x1e9   :  { %v299_v42 = vmul.f32 %v297_v41, %v293_v40 }
 0x1eb   :  { %301 = vrot.lane.b32.xlu1 %v299_v42, %s1742_s20 }
 0x25d   :  { %v302_v44 = vpop.permute.xlu1 %301 }
 0x25e   :  { %v304_v45 = vadd.f32 %v302_v44, %v294_v43 }
 0x260   :  { %1638 = vtanh.f32 %v304_v45 }
 0x26d   :  { %v1639_v46 = vpop.eup %1638 }
 0x26e   :  { %307 = vrot.lane.b32.xlu0 %v1639_v46, %s1741_s1 }
 0x2e0   :  { %v308_v47 = vpop.permute.xlu0 %307 }
 0x2e1   :  { %v310_v48 = vmul.f32 %v308_v47, %v293_v40  ;;  %v29_v47 = vld [vmem:[%s2026_s0 + $0x20] sm:$0xff] }
 0x2e3   :  { %312 = vrot.lane.b32.xlu1 %v310_v48, %s1742_s20 }
 0x355   :  { %v1815_v49 = vpop.permute.xlu1 %312 }
 0x356   :  { %1489 = vmatmul.mubr.msk.f32.vlgmr.msra.gmra.mxu1 %vm211_vm6, %v1815_v49 }
 0x357   :  { %1492 = vmatpush3.msra.mxu1 %v1770_v8  ;;  %1499 = vmatprep.mubr.msk.f32.mxu1 %vm1739_vm0, %v1738_v1 }
 0x358   :  { %1493 = vmatprep.subr.mxu1 %v1738_v1 }
 0x359   :  { %1494 = vmatpush3.msra.mxu1 %v1772_v9 }
 0x35a   :  { %1495 = vmatprep.subr.mxu1 %v1738_v1 }
 0x35b   :  { %1496 = vmatpush3.msra.mxu1 %v1776_v11 }
 0x35c   :  { %1497 = vmatprep.subr.mxu1 %v1738_v1 }
 0x35d   :  { %1498 = vmatpush3.msra.mxu1 %v1780_v13 }
 0x35e   :  { %1502 = vmatprep.subr.mxu1 %v1738_v1 }
 0x416   :  { %v382_v50 = vpop.f32.mrf.mxu1 }
 0x417   :  { %v386_v51 = vadd.f32 %v1459_v31, %v382_v50 }
 0x418   :  { %v1490_v52 = vpop.f32.mrf.mxu1 }
 0x419   :  { %v1302_v53 = vmul.f32 -1.442695, %v386_v51 }
 0x41b   :  { %1640 = vpow2.f32 %v1302_v53 }
 0x41c   :  { %1642 = vtanh.f32 %v386_v51 }
 0x428   :  { %v1641_v54 = vpop.eup %1640 }
 0x429   :  { %v391_v55 = vadd.f32 1.0, %v1641_v54  ;;  %v1643_v56 = vpop.eup %1642  ;;  %v30_v54 = vld [vmem:[%s2026_s0 + $0x28] sm:$0xff] }
 0x42b   :  { %1644 = vrcp.f32 %v391_v55 }
 0x438   :  { %v1645_v57 = vpop.eup %1644 }
 0x439   :  { %v394_v58 = vsel %vm1805_vm5, %v1643_v56, %v1645_v57 }
 0x43a   :  { %397 = vrot.lane.b32.xlu0 %v394_v58, %s1741_s1  ;;  %v395_v62 = vmul.f32 %v394_v58, %v304_v45 }
 0x4ac   :  { %v398_v59 = vpop.permute.xlu0 %397 }
 0x4ad   :  { %v400_v60 = vmul.f32 %v398_v59, %v394_v58 }
 0x4af   :  { %402 = vrot.lane.b32.xlu1 %v400_v60, %s1742_s20 }
 0x4b3   :  { %42 = vperm.xlu1 %1631, %v27_v61  }
 0x521   :  { %v403_v63 = vpop.permute.xlu1 %402 }
 0x522   :  { %v405_v0 = vadd.f32 %v403_v63, %v395_v62 }
 0x524   :  { %1646 = vtanh.f32 %v405_v0 }
 0x52e   :  { %v43_v2 = vpop.permute.xlu1 %42 }
 0x52f   :  { %vm61_vm7 = vcmp.eq.s32.totalorder %v1797_v25, %v43_v2 }
 0x530   :  { %1460 = vmatprep.mubr.msk.f32.mxu0 %vm61_vm7, %v1740_v27 }
 0x531   :  { %v1647_v3 = vpop.eup %1646 }
 0x532   :  { %408 = vrot.lane.b32.xlu0 %v1647_v3, %s1741_s1 }
 0x536   :  { %45 = vperm.xlu0 %1630, %v28_v4  }
 0x5a4   :  { %v409_v5 = vpop.permute.xlu0 %408 }
 0x5a5   :  { %v411_v6 = vmul.f32 %v409_v5, %v394_v58 }
 0x5a7   :  { %413 = vrot.lane.b32.xlu1 %v411_v6, %s1742_s20 }
 0x5b1   :  { %v46_v7 = vpop.permute.xlu0 %45 }
 0x5b2   :  { %vm62_vm8 = vcmp.eq.s32.totalorder %v1797_v25, %v46_v7 }
 0x5b3   :  { %1461 = vmatmul.mubr.msk.f32.gmra.mxu0 %vm62_vm8, %v1740_v27 }
 0x619   :  { %v1845_v10 = vpop.permute.xlu1 %413 }
 0x61a   :  { %1500 = vmatmul.mubr.msk.f32.vlgmr.msra.gmra.mxu1 %vm211_vm6, %v1845_v10 }
 0x61b   :  { %1503 = vmatpush3.msra.mxu1 %v1770_v8  ;;  %1510 = vmatprep.mubr.msk.f32.mxu1 %vm1739_vm0, %v1738_v1 }
 0x61c   :  { %1504 = vmatprep.subr.mxu1 %v1738_v1 }
 0x61d   :  { %1505 = vmatpush3.msra.mxu1 %v1772_v9 }
 0x61e   :  { %1506 = vmatprep.subr.mxu1 %v1738_v1 }
 0x61f   :  { %1507 = vmatpush3.msra.mxu1 %v1776_v11 }
 0x620   :  { %1508 = vmatprep.subr.mxu1 %v1738_v1 }
 0x621   :  { %1509 = vmatpush3.msra.mxu1 %v1780_v13 }
 0x622   :  { %1513 = vmatprep.subr.mxu1 %v1738_v1 }
 0x673   :  { %v1462_v12 = vpop.f32.mrf.mxu0 }
 0x675   :  { %v175_v14 = vpop.f32.mrf.mxu0 }
 0x6da   :  { %v483_v15 = vpop.f32.mrf.mxu1 }
 0x6db   :  { %v487_v16 = vadd.f32 %v483_v15, %v175_v14 }
 0x6dc   :  { %v1501_v17 = vpop.f32.mrf.mxu1 }
 0x6dd   :  { %v1304_v18 = vmul.f32 -1.442695, %v487_v16 }
 0x6df   :  { %1648 = vpow2.f32 %v1304_v18 }
 0x6e0   :  { %1650 = vtanh.f32 %v487_v16 }
 0x6ec   :  { %v1649_v19 = vpop.eup %1648 }
 0x6ed   :  { %v492_v20 = vadd.f32 1.0, %v1649_v19  ;;  %v1651_v21 = vpop.eup %1650 }
 0x6ef   :  { %1652 = vrcp.f32 %v492_v20 }
 0x6fc   :  { %v1653_v22 = vpop.eup %1652 }
 0x6fd   :  { %v495_v23 = vsel %vm1805_vm5, %v1651_v21, %v1653_v22 }
 0x6fe   :  { %498 = vrot.lane.b32.xlu0 %v495_v23, %s1741_s1  ;;  %v496_v28 = vmul.f32 %v495_v23, %v405_v0 }
 0x770   :  { %v499_v24 = vpop.permute.xlu0 %498 }
 0x771   :  { %v501_v26 = vmul.f32 %v499_v24, %v495_v23 }
 0x773   :  { %503 = vrot.lane.b32.xlu1 %v501_v26, %s1742_s20 }
 0x7e5   :  { %v504_v29 = vpop.permute.xlu1 %503 }
 0x7e6   :  { %v506_v30 = vadd.f32 %v504_v29, %v496_v28 }
 0x7e8   :  { %1654 = vtanh.f32 %v506_v30 }
 0x7f5   :  { %v1655_v31 = vpop.eup %1654 }
 0x7f6   :  { %509 = vrot.lane.b32.xlu0 %v1655_v31, %s1741_s1 }
 0x868   :  { %v510_v32 = vpop.permute.xlu0 %509 }
 0x869   :  { %v512_v33 = vmul.f32 %v510_v32, %v495_v23 }
 0x86b   :  { %514 = vrot.lane.b32.xlu1 %v512_v33, %s1742_s20 }
 0x8dd   :  { %v1865_v34 = vpop.permute.xlu1 %514 }
 0x8de   :  { %1511 = vmatmul.mubr.msk.f32.vlgmr.msra.gmra.mxu1 %vm211_vm6, %v1865_v34 }
 0x8df   :  { %1514 = vmatpush3.msra.mxu1 %v1770_v8  ;;  %1521 = vmatprep.mubr.msk.f32.mxu1 %vm1739_vm0, %v1738_v1 }
 0x8e0   :  { %1515 = vmatprep.subr.mxu1 %v1738_v1 }
 0x8e1   :  { %1516 = vmatpush3.msra.mxu1 %v1772_v9 }
 0x8e2   :  { %1517 = vmatprep.subr.mxu1 %v1738_v1 }
 0x8e3   :  { %1518 = vmatpush3.msra.mxu1 %v1776_v11 }
 0x8e4   :  { %1519 = vmatprep.subr.mxu1 %v1738_v1 }
 0x8e5   :  { %1520 = vmatpush3.msra.mxu1 %v1780_v13 }
 0x8e6   :  { %1524 = vmatprep.subr.mxu1 %v1738_v1 }
 0x99e   :  { %v584_v35 = vpop.f32.mrf.mxu1 }
 0x99f   :  { %v588_v36 = vadd.f32 %v1462_v12, %v584_v35  ;;  %v31_v35 = vld [vmem:[%s2026_s0 + $0x30] sm:$0xff] }
 0x9a0   :  { %v1512_v38 = vpop.f32.mrf.mxu1 }
 0x9a1   :  { %v1306_v39 = vmul.f32 -1.442695, %v588_v36 }
 0x9a3   :  { %1656 = vpow2.f32 %v1306_v39 }
 0x9a4   :  { %1658 = vtanh.f32 %v588_v36 }
 0x9b0   :  { %v1657_v40 = vpop.eup %1656 }
 0x9b1   :  { %v593_v41 = vadd.f32 1.0, %v1657_v40  ;;  %v1659_v42 = vpop.eup %1658 }
 0x9b3   :  { %1660 = vrcp.f32 %v593_v41 }
 0x9c0   :  { %v1661_v43 = vpop.eup %1660 }
 0x9c1   :  { %v596_v44 = vsel %vm1805_vm5, %v1659_v42, %v1661_v43  ;;  %v32_v42 = vld [vmem:[%s2026_s0 + $0x38] sm:$0xff] }
 0x9c2   :  { %599 = vrot.lane.b32.xlu0 %v596_v44, %s1741_s1  ;;  %v597_v48 = vmul.f32 %v596_v44, %v506_v30 }
 0xa34   :  { %v600_v45 = vpop.permute.xlu0 %599 }
 0xa35   :  { %v602_v46 = vmul.f32 %v600_v45, %v596_v44 }
 0xa37   :  { %604 = vrot.lane.b32.xlu1 %v602_v46, %s1742_s20 }
 0xa3b   :  { %48 = vperm.xlu1 %1631, %v29_v47  }
 0xaa9   :  { %v605_v50 = vpop.permute.xlu1 %604 }
 0xaaa   :  { %v607_v51 = vadd.f32 %v605_v50, %v597_v48 }
 0xaac   :  { %1662 = vtanh.f32 %v607_v51 }
 0xab6   :  { %v49_v52 = vpop.permute.xlu1 %48 }
 0xab7   :  { %vm63_vm9 = vcmp.eq.s32.totalorder %v1797_v25, %v49_v52 }
 0xab8   :  { %1463 = vmatprep.mubr.msk.f32.mxu0 %vm63_vm9, %v1740_v27 }
 0xab9   :  { %v1663_v53 = vpop.eup %1662 }
 0xaba   :  { %610 = vrot.lane.b32.xlu0 %v1663_v53, %s1741_s1 }
 0xabe   :  { %51 = vperm.xlu0 %1630, %v30_v54  }
 0xb2c   :  { %v611_v55 = vpop.permute.xlu0 %610 }
 0xb2d   :  { %v613_v56 = vmul.f32 %v611_v55, %v596_v44 }
 0xb2f   :  { %615 = vrot.lane.b32.xlu1 %v613_v56, %s1742_s20 }
 0xb39   :  { %v52_v57 = vpop.permute.xlu0 %51 }
 0xb3a   :  { %vm64_vm10 = vcmp.eq.s32.totalorder %v1797_v25, %v52_v57  ;;  %v1021_v57 = vld [vmem:[#allocation2 + $0xb8] sm:$0xff] }
 0xb3b   :  { %1464 = vmatmul.mubr.msk.f32.gmra.mxu0 %vm64_vm10, %v1740_v27 }
 0xba1   :  { %v1895_v58 = vpop.permute.xlu1 %615 }
 0xba2   :  { %1522 = vmatmul.mubr.msk.f32.vlgmr.msra.gmra.mxu1 %vm211_vm6, %v1895_v58 }
 0xba3   :  { %1525 = vmatpush3.msra.mxu1 %v1770_v8  ;;  %1532 = vmatprep.mubr.msk.f32.mxu1 %vm1739_vm0, %v1738_v1 }
 0xba4   :  { %1526 = vmatprep.subr.mxu1 %v1738_v1 }
 0xba5   :  { %1527 = vmatpush3.msra.mxu1 %v1772_v9 }
 0xba6   :  { %1528 = vmatprep.subr.mxu1 %v1738_v1 }
 0xba7   :  { %1529 = vmatpush3.msra.mxu1 %v1776_v11 }
 0xba8   :  { %1530 = vmatprep.subr.mxu1 %v1738_v1 }
 0xba9   :  { %1531 = vmatpush3.msra.mxu1 %v1780_v13 }
 0xbaa   :  { %1535 = vmatprep.subr.mxu1 %v1738_v1 }
 0xbfb   :  { %v1465_v59 = vpop.f32.mrf.mxu0 }
 0xbfd   :  { %v185_v60 = vpop.f32.mrf.mxu0 }
 0xc62   :  { %v685_v61 = vpop.f32.mrf.mxu1 }
 0xc63   :  { %v689_v62 = vadd.f32 %v685_v61, %v185_v60 }
 0xc64   :  { %v1523_v63 = vpop.f32.mrf.mxu1 }
 0xc65   :  { %v1308_v0 = vmul.f32 -1.442695, %v689_v62  ;;  %v1159_v63 = vld [vmem:[#allocation2 + $0x138] sm:$0xff] }
 0xc67   :  { %1664 = vpow2.f32 %v1308_v0  ;;  %v1158_v0 = vld [vmem:[#allocation2 + $0x130] sm:$0xff] }
 0xc68   :  { %1666 = vtanh.f32 %v689_v62  ;;  %v1160_v62 = vld [vmem:[#allocation2 + $0x140] sm:$0xff] }
 0xc69   :  { %1577 = vmatprep.subr.mxu0 %v1160_v62 }
 0xc6a   :  { %1578 = vmatpush3.msra.mxu0 %v1160_v62 }
 0xc6b   :  { %1579 = vmatprep.subr.mxu0 %v1159_v63 }
 0xc6c   :  { %1580 = vmatpush3.msra.mxu0 %v1159_v63 }
 0xc6d   :  { %1581 = vmatprep.subr.mxu0 %v1158_v0 }
 0xc6e   :  { %1582 = vmatpush3.msra.mxu0 %v1158_v0 }
 0xc74   :  { %v1665_v2 = vpop.eup %1664 }
 0xc75   :  { %v694_v3 = vadd.f32 1.0, %v1665_v2  ;;  %v1667_v4 = vpop.eup %1666 }
 0xc77   :  { %1668 = vrcp.f32 %v694_v3  ;;  %v1020_v3 = vld [vmem:[#allocation2 + $0xb0] sm:$0xff] }
 0xc84   :  { %v1669_v5 = vpop.eup %1668 }
 0xc85   :  { %v697_v6 = vsel %vm1805_vm5, %v1667_v4, %v1669_v5  ;;  %v1019_v4 = vld [vmem:[#allocation2 + $0xa8] sm:$0xff]  ;;  %v1018_v5 = vld [vmem:[#allocation2 + $0xa0] sm:$0xff] }
 0xc86   :  { %700 = vrot.lane.b32.xlu0 %v697_v6, %s1741_s1  ;;  %v698_v14 = vmul.f32 %v697_v6, %v607_v51 }
 0xcf8   :  { %v701_v7 = vpop.permute.xlu0 %700 }
 0xcf9   :  { %v703_v12 = vmul.f32 %v701_v7, %v697_v6  ;;  %v1152_v7 = vld [vmem:[#allocation2 + $0x100] sm:$0xff] }
 0xcfb   :  { %705 = vrot.lane.b32.xlu1 %v703_v12, %s1742_s20  ;;  %v1151_v12 = vld [vmem:[#allocation2 + $0xf8] sm:$0xff] }
 0xd6d   :  { %v706_v15 = vpop.permute.xlu1 %705 }
 0xd6e   :  { %v708_v16 = vadd.f32 %v706_v15, %v698_v14  ;;  %v1150_v14 = vld [vmem:[#allocation2 + $0xf0] sm:$0xff]  ;;  %v1149_v15 = vld [vmem:[#allocation2 + $0xe8] sm:$0xff] }
 0xd70   :  { %1670 = vtanh.f32 %v708_v16 }
 0xd7d   :  { %v1671_v17 = vpop.eup %1670 }
 0xd7e   :  { %711 = vrot.lane.b32.xlu0 %v1671_v17, %s1741_s1  ;;  %v1147_v17 = vld [vmem:[#allocation2 + $0xd8] sm:$0xff] }
 0xdf0   :  { %v712_v18 = vpop.permute.xlu0 %711 }
 0xdf1   :  { %v714_v19 = vmul.f32 %v712_v18, %v697_v6  ;;  %v1156_v6 = vld [vmem:[#allocation2 + $0x120] sm:$0xff]  ;;  %v1146_v18 = vld [vmem:[#allocation2 + $0xd0] sm:$0xff] }
 0xdf3   :  { %716 = vrot.lane.b32.xlu1 %v714_v19, %s1742_s20  ;;  %v1145_v19 = vld [vmem:[#allocation2 + $0xc8] sm:$0xff] }
 0xe65   :  { %v1915_v20 = vpop.permute.xlu1 %716 }
 0xe66   :  { %1533 = vmatmul.mubr.msk.f32.vlgmr.msra.gmra.mxu1 %vm211_vm6, %v1915_v20 }
 0xe67   :  { %1536 = vmatpush3.msra.mxu1 %v1770_v8  ;;  %1543 = vmatprep.mubr.msk.f32.mxu1 %vm1739_vm0, %v1738_v1 }
 0xe68   :  { %1537 = vmatprep.subr.mxu1 %v1738_v1 }
 0xe69   :  { %1538 = vmatpush3.msra.mxu1 %v1772_v9 }
 0xe6a   :  { %1539 = vmatprep.subr.mxu1 %v1738_v1 }
 0xe6b   :  { %1540 = vmatpush3.msra.mxu1 %v1776_v11 }
 0xe6c   :  { %1541 = vmatprep.subr.mxu1 %v1738_v1 }
 0xe6d   :  { %1542 = vmatpush3.msra.mxu1 %v1780_v13 }
 0xe6e   :  { %1546 = vmatprep.subr.mxu1 %v1738_v1 }
 0xf26   :  { %v786_v21 = vpop.f32.mrf.mxu1 }
 0xf27   :  { %v790_v22 = vadd.f32 %v1465_v59, %v786_v21 }
 0xf28   :  { %v1534_v23 = vpop.f32.mrf.mxu1 }
 0xf29   :  { %v1310_v24 = vmul.f32 -1.442695, %v790_v22 }
 0xf2b   :  { %1672 = vpow2.f32 %v1310_v24  ;;  %v1984_v24 = vld [vmem:[#allocation2 + $0xc0] ss:$0 sm:$0xff] }
 0xf2c   :  { %1674 = vtanh.f32 %v790_v22 }
 0xf38   :  { %v1673_v26 = vpop.eup %1672 }
 0xf39   :  { %v795_v28 = vadd.f32 1.0, %v1673_v26  ;;  %v1675_v29 = vpop.eup %1674 }
 0xf3b   :  { %1676 = vrcp.f32 %v795_v28 }
 0xf48   :  { %v1677_v30 = vpop.eup %1676 }
 0xf49   :  { %v798_v31 = vsel %vm1805_vm5, %v1675_v29, %v1677_v30 }
 0xf4a   :  { %801 = vrot.lane.b32.xlu0 %v798_v31, %s1741_s1  ;;  %v799_v36 = vmul.f32 %v798_v31, %v708_v16  ;;  %v1148_v16 = vld [vmem:[#allocation2 + $0xe0] sm:$0xff] }
 0xfbc   :  { %v802_v32 = vpop.permute.xlu0 %801 }
 0xfbd   :  { %v804_v33 = vmul.f32 %v802_v32, %v798_v31 }
 0xfbf   :  { %806 = vrot.lane.b32.xlu1 %v804_v33, %s1742_s20 }
 0xfc3   :  { %54 = vperm.xlu1 %1631, %v31_v35  }
0x1031   :  { %v807_v38 = vpop.permute.xlu1 %806 }
0x1032   :  { %v809_v39 = vadd.f32 %v807_v38, %v799_v36 }
0x1034   :  { %1678 = vtanh.f32 %v809_v39 }
0x103e   :  { %v55_v40 = vpop.permute.xlu1 %54 }
0x103f   :  { %vm65_vm11 = vcmp.eq.s32.totalorder %v1797_v25, %v55_v40 }
0x1040   :  { %1466 = vmatprep.mubr.msk.f32.mxu0 %vm65_vm11, %v1740_v27 }
0x1041   :  { %v1679_v41 = vpop.eup %1678 }
0x1042   :  { %812 = vrot.lane.b32.xlu0 %v1679_v41, %s1741_s1 }
0x1046   :  { %57 = vperm.xlu0 %1630, %v32_v42  }
0x10b4   :  { %v813_v43 = vpop.permute.xlu0 %812 }
0x10b5   :  { %v815_v44 = vmul.f32 %v813_v43, %v798_v31 }
0x10b7   :  { %817 = vrot.lane.b32.xlu1 %v815_v44, %s1742_s20 }
0x10c1   :  { %v58_v45 = vpop.permute.xlu0 %57 }
0x10c2   :  { %vm66_vm12 = vcmp.eq.s32.totalorder %v1797_v25, %v58_v45 }
0x10c3   :  { %1467 = vmatmul.mubr.msk.f32.gmra.mxu0 %vm66_vm12, %v1740_v27 }
0x1129   :  { %v1945_v46 = vpop.permute.xlu1 %817 }
0x112a   :  { %1544 = vmatmul.mubr.msk.f32.vlgmr.msra.gmra.mxu1 %vm211_vm6, %v1945_v46 }
0x112b   :  { %1547 = vmatpush3.msra.mxu1 %v1770_v8  ;;  %1554 = vmatprep.mubr.msk.f32.mxu1 %vm1739_vm0, %v1738_v1 }
0x112c   :  { %1548 = vmatprep.subr.mxu1 %v1738_v1 }
0x112d   :  { %1549 = vmatpush3.msra.mxu1 %v1772_v9 }
0x112e   :  { %1550 = vmatprep.subr.mxu1 %v1738_v1 }
0x112f   :  { %1551 = vmatpush3.msra.mxu1 %v1776_v11 }
0x1130   :  { %1552 = vmatprep.subr.mxu1 %v1738_v1 }
0x1131   :  { %1553 = vmatpush3.msra.mxu1 %v1780_v13 }
0x1132   :  { %1557 = vmatprep.subr.mxu1 %v1021_v57 }
0x1183   :  { %v1958_v25 = vpop.f32.mrf.mxu0 }
0x1185   :  { %v195_v27 = vpop.f32.mrf.mxu0 }
0x11ea   :  { %v887_v47 = vpop.f32.mrf.mxu1 }
0x11eb   :  { %v891_v8 = vadd.f32 %v887_v47, %v195_v27 }
0x11ec   :  { %v1545_v48 = vpop.f32.mrf.mxu1 }
0x11ed   :  { %v1312_v50 = vmul.f32 -1.442695, %v891_v8 }
0x11ef   :  { %1680 = vpow2.f32 %v1312_v50 }
0x11f0   :  { %1682 = vtanh.f32 %v891_v8 }
0x11fc   :  { %v1681_v51 = vpop.eup %1680 }
0x11fd   :  { %v896_v52 = vadd.f32 1.0, %v1681_v51  ;;  %v1683_v9 = vpop.eup %1682 }
0x11ff   :  { %1684 = vrcp.f32 %v896_v52  ;;  %v1324_v52 = vld [vmem:[#allocation2 + $0x148] ss:$0 sm:$0xff] }
0x120c   :  { %v1685_v53 = vpop.eup %1684 }
0x120d   :  { %v899_v11 = vsel %vm1805_vm5, %v1683_v9, %v1685_v53 }
0x120e   :  { %902 = vrot.lane.b32.xlu0 %v899_v11, %s1741_s1  ;;  %v900_v54 = vmul.f32 %v899_v11, %v809_v39 }
0x1280   :  { %v903_v1 = vpop.permute.xlu0 %902 }
0x1281   :  { %v905_v13 = vmul.f32 %v903_v1, %v899_v11 }
0x1283   :  { %907 = vrot.lane.b32.xlu1 %v905_v13, %s1742_s20 }
0x12f5   :  { %v908_v55 = vpop.permute.xlu1 %907 }
0x12f6   :  { %v1964_v56 = vadd.f32 %v908_v55, %v900_v54 }
0x12f8   :  { %1686 = vtanh.f32 %v1964_v56 }
0x1305   :  { %v1687_v59 = vpop.eup %1686 }
0x1306   :  { %913 = vrot.lane.b32.xlu0 %v1687_v59, %s1741_s1 }
0x1378   :  { %v914_v60 = vpop.permute.xlu0 %913 }
0x1379   :  { %v916_v61 = vmul.f32 %v914_v60, %v899_v11 }
0x137b   :  { %918 = vrot.lane.b32.xlu1 %v916_v61, %s1742_s20 }
0x13ed   :  { %v919_v2 = vpop.permute.xlu1 %918 }
0x13ee   :  { %1555 = vmatmul.mubr.msk.f32.vlgmr.msra.gmra.mxu1 %vm211_vm6, %v919_v2 }
0x13ef   :  { %1558 = vmatpush3.msra.mxu1 %v1021_v57  ;;  %1565 = vmatprep.mubr.msk.f32.mxu1 %vm211_vm6, %v1815_v49  ;;  %v1157_v49 = vld [vmem:[#allocation2 + $0x128] sm:$0xff] }
0x13f0   :  { %1559 = vmatprep.subr.mxu1 %v1020_v3  ;;  %1583 = vmatprep.subr.mxu0 %v1157_v49 }
0x13f1   :  { %1560 = vmatpush3.msra.mxu1 %v1020_v3  ;;  %1584 = vmatpush3.msra.mxu0 %v1157_v49 }
0x13f2   :  { %1561 = vmatprep.subr.mxu1 %v1019_v4  ;;  %1585 = vmatprep.subr.mxu0 %v1156_v6 }
0x13f3   :  { %1562 = vmatpush3.msra.mxu1 %v1019_v4  ;;  %1586 = vmatpush3.msra.mxu0 %v1156_v6 }
0x13f4   :  { %1563 = vmatprep.subr.mxu1 %v1018_v5 }
0x13f5   :  { %1564 = vmatpush3.msra.mxu1 %v1018_v5 }
0x13f6   :  { %1566 = vmatmul.mubr.msk.f32.vlgmr.msra.gmra.mxu1 %vm211_vm6, %v1845_v10  ;;  %v1155_v10 = vld [vmem:[#allocation2 + $0x118] sm:$0xff] }
0x13f7   :  { %1568 = vmatprep.mubr.msk.f32.mxu1 %vm211_vm6, %v1865_v34  ;;  %1587 = vmatprep.subr.mxu0 %v1155_v10  ;;  %v1154_v34 = vld [vmem:[#allocation2 + $0x110] sm:$0xff] }
0x13f8   :  { %1588 = vmatpush3.msra.mxu0 %v1155_v10 }
0x13f9   :  { %1589 = vmatprep.subr.mxu0 %v1154_v34 }
0x13fa   :  { %1569 = vmatmul.mubr.msk.f32.gmra.mxu1 %vm211_vm6, %v1895_v58  ;;  %1590 = vmatpush3.msra.mxu0 %v1154_v34  ;;  %v1153_v58 = vld [vmem:[#allocation2 + $0x108] sm:$0xff] }
0x13fb   :  { %1571 = vmatprep.mubr.msk.f32.mxu1 %vm211_vm6, %v1915_v20  ;;  %1591 = vmatprep.subr.mxu0 %v1153_v58 }
0x13fc   :  { %1592 = vmatpush3.msra.mxu0 %v1153_v58 }
0x13fd   :  { %1593 = vmatprep.subr.mxu0 %v1152_v7 }
0x13fe   :  { %1572 = vmatmul.mubr.msk.f32.gmra.mxu1 %vm211_vm6, %v1945_v46  ;;  %1594 = vmatpush3.msra.mxu0 %v1152_v7 }
0x13ff   :  { %1574 = vmatprep.mubr.msk.f32.mxu1 %vm211_vm6, %v919_v2  ;;  %1595 = vmatprep.subr.mxu0 %v1151_v12 }
0x1400   :  { %1596 = vmatpush3.msra.mxu0 %v1151_v12 }
0x1401   :  { %1597 = vmatprep.subr.mxu0 %v1150_v14 }
0x1402   :  { %1598 = vmatpush3.msra.mxu0 %v1150_v14 }
0x1403   :  { %1599 = vmatprep.subr.mxu0 %v1149_v15 }
0x1404   :  { %1600 = vmatpush3.msra.mxu0 %v1149_v15 }
0x1405   :  { %1601 = vmatprep.subr.mxu0 %v1148_v16 }
0x1406   :  { %1602 = vmatpush3.msra.mxu0 %v1148_v16 }
0x1407   :  { %1603 = vmatprep.subr.mxu0 %v1147_v17 }
0x1408   :  { %1604 = vmatpush3.msra.mxu0 %v1147_v17 }
0x1409   :  { %1605 = vmatprep.subr.mxu0 %v1146_v18 }
0x140a   :  { %1606 = vmatpush3.msra.mxu0 %v1146_v18 }
0x140b   :  { %1607 = vmatprep.subr.mxu0 %v1145_v19 }
0x140c   :  { %1608 = vmatpush3.msra.mxu0 %v1145_v19 }
0x14ae   :  { %v988_v20 = vpop.f32.mrf.mxu1 }
0x14af   :  { %v992_v21 = vadd.f32 %v1958_v25, %v988_v20 }
0x14b0   :  { %v1556_v22 = vpop.f32.mrf.mxu1 }
0x14b1   :  { %v1314_v23 = vmul.f32 -1.442695, %v992_v21 }
0x14b3   :  { %1688 = vpow2.f32 %v1314_v23 }
0x14b6   :  { %v1567_v26 = vpop.f32.mrf.mxu1 }
0x14b7   :  { %v1104_v28 = vadd.f32 %v1567_v26, %v1984_v24 }
0x14b8   :  { %v1098_v29 = vpop.f32.mrf.mxu1 }
0x14b9   :  { %v1099_v30 = vadd.f32 %v1984_v24, %v1098_v29 }
0x14ba   :  { %v1570_v31 = vpop.f32.mrf.mxu1 }
0x14bb   :  { %1690 = vtanh.f32 %v1099_v30  ;;  %v1114_v32 = vadd.f32 %v1570_v31, %v1984_v24 }
0x14bc   :  { %1692 = vtanh.f32 %v1104_v28  ;;  %v1108_v33 = vpop.f32.mrf.mxu1 }
0x14bd   :  { %v1109_v35 = vadd.f32 %v1984_v24, %v1108_v33 }
0x14be   :  { %v1573_v36 = vpop.f32.mrf.mxu1 }
0x14bf   :  { %1694 = vtanh.f32 %v1109_v35  ;;  %v1124_v41 = vadd.f32 %v1573_v36, %v1984_v24 }
0x14c0   :  { %v1689_v38 = vpop.eup %1688  ;;  %1696 = vtanh.f32 %v1114_v32  ;;  %v1118_v39 = vpop.f32.mrf.mxu1 }
0x14c1   :  { %v997_v40 = vadd.f32 1.0, %v1689_v38  ;;  %v1119_v42 = vadd.f32 %v1984_v24, %v1118_v39  ;;  %1698 = vtanh.f32 %v992_v21 }
0x14c3   :  { %1700 = vrcp.f32 %v997_v40 }
0x14c4   :  { %1702 = vtanh.f32 %v1119_v42 }
0x14c5   :  { %1704 = vtanh.f32 %v1124_v41 }
0x14c8   :  { %v1691_v43 = vpop.eup %1690 }
0x14c9   :  { %v1693_v44 = vpop.eup %1692  ;;  %1609 = vmatprep.mubr.f32.mxu0 %v1691_v43 }
0x14ca   :  { %1610 = vmatmul.mubr.f32.vlgmr.msra.gmra.mxu0 %v1693_v44 }
0x14cc   :  { %v1695_v45 = vpop.eup %1694 }
0x14cd   :  { %v1697_v46 = vpop.eup %1696  ;;  %1612 = vmatprep.mubr.f32.mxu0 %v1695_v45 }
0x14ce   :  { %1613 = vmatmul.mubr.f32.gmra.mxu0 %v1697_v46  ;;  %v1699_v25 = vpop.eup %1698 }
0x14d0   :  { %v1701_v27 = vpop.eup %1700 }
0x14d1   :  { %v1703_v47 = vpop.eup %1702  ;;  %v1000_v8 = vsel %vm1805_vm5, %v1699_v25, %v1701_v27 }
0x14d2   :  { %v1705_v48 = vpop.eup %1704  ;;  %1615 = vmatprep.mubr.f32.mxu0 %v1703_v47  ;;  %1003 = vrot.lane.b32.xlu0 %v1000_v8, %s1741_s1  ;;  %v1001_v62 = vmul.f32 %v1000_v8, %v1964_v56 }
0x14d3   :  { %1616 = vmatmul.mubr.f32.gmra.mxu0 %v1705_v48 }
0x1544   :  { %v1004_v50 = vpop.permute.xlu0 %1003 }
0x1545   :  { %v1006_v51 = vmul.f32 %v1004_v50, %v1000_v8 }
0x1547   :  { %1008 = vrot.lane.b32.xlu1 %v1006_v51, %s1742_s20 }
0x158a   :  { %v1611_v9 = vpop.f32.mrf.mxu0 }
0x158b   :  { %v1238_v53 = vadd.f32 %v1611_v9, %v1324_v52 }
0x158c   :  { %v1232_v11 = vpop.f32.mrf.mxu0 }
0x158d   :  { %1272 = vst [vmem:[%s2028_s2 + $0x8] sm:$0xff] %v1238_v53  ;;  %v1233_v1 = vadd.f32 %v1324_v52, %v1232_v11 }
0x158e   :  { %v1614_v37 = vpop.f32.mrf.mxu0 }
0x158f   :  { %1271 = vst [vmem:[%s2028_s2] sm:$0xff] %v1233_v1  ;;  %v1248_v13 = vadd.f32 %v1614_v37, %v1324_v52 }
0x1590   :  { %v1242_v54 = vpop.f32.mrf.mxu0 }
0x1591   :  { %1274 = vst [vmem:[%s2028_s2 + $0x18] sm:$0xff] %v1248_v13  ;;  %v1243_v55 = vadd.f32 %v1324_v52, %v1242_v54 }
0x1593   :  { %1273 = vst [vmem:[%s2028_s2 + $0x10] sm:$0xff] %v1243_v55  ;;  %v1617_v57 = vpop.f32.mrf.mxu0 }
0x1594   :  { %v1258_v59 = vadd.f32 %v1617_v57, %v1324_v52 }
0x1595   :  { %v1252_v60 = vpop.f32.mrf.mxu0 }
0x1596   :  { %1276 = vst [vmem:[%s2028_s2 + $0x28] sm:$0xff] %v1258_v59  ;;  %v1253_v61 = vadd.f32 %v1324_v52, %v1252_v60 }
0x1598   :  { %1275 = vst [vmem:[%s2028_s2 + $0x20] sm:$0xff] %v1253_v61 }
0x15b9   :  { %v1009_v63 = vpop.permute.xlu1 %1008 }
0x15ba   :  { %v1011_v0 = vadd.f32 %v1009_v63, %v1001_v62 }
0x15bc   :  { %1706 = vtanh.f32 %v1011_v0 }
0x15c9   :  { %v1707_v2 = vpop.eup %1706 }
0x15ca   :  { %1014 = vrot.lane.b32.xlu0 %v1707_v2, %s1741_s1 }
0x163c   :  { %v1015_v3 = vpop.permute.xlu0 %1014 }
0x163d   :  { %v1017_v4 = vmul.f32 %v1015_v3, %v1000_v8 }
0x163f   :  { %1028 = vrot.lane.b32.xlu1 %v1017_v4, %s1742_s20 }
0x16b1   :  { %v1029_v5 = vpop.permute.xlu1 %1028 }
0x16b2   :  { %1575 = vmatmul.mubr.msk.f32.gmra.mxu1 %vm211_vm6, %v1029_v5 }
0x1772   :  { %v1576_v49 = vpop.f32.mrf.mxu1 }
0x1773   :  { %v1134_v6 = vadd.f32 %v1576_v49, %v1984_v24 }
0x1774   :  { %v1128_v10 = vpop.f32.mrf.mxu1 }
0x1775   :  { %v1129_v34 = vadd.f32 %v1984_v24, %v1128_v10 }
0x1777   :  { %1708 = vtanh.f32 %v1129_v34 }
0x1778   :  { %1710 = vtanh.f32 %v1134_v6 }
0x1784   :  { %v1709_v56 = vpop.eup %1708 }
0x1785   :  { %v1711_v58 = vpop.eup %1710  ;;  %1618 = vmatprep.mubr.f32.mxu0 %v1709_v56 }
0x1786   :  { %1619 = vmatmul.mubr.f32.gmra.mxu0 %v1711_v58 }
0x1846   :  { %v1620_v7 = vpop.f32.mrf.mxu0 }
0x1847   :  { %v1268_v12 = vadd.f32 %v1620_v7, %v1324_v52 }
0x1848   :  { %v1262_v14 = vpop.f32.mrf.mxu0 }
0x1849   :  { %1278 = vst [vmem:[%s2028_s2 + $0x38] sm:$0xff] %v1268_v12  ;;  %v1263_v15 = vadd.f32 %v1324_v52, %v1262_v14 }
0x184b   :  { %1277 = vst [vmem:[%s2028_s2 + $0x30] sm:$0xff] %v1263_v15 }
0x184c   :  { %1283 = vsyncpa [#allocation3], 1 }

</bundles_post_ra>
